<compile_context>
chip_gen: v7x
topology: tpu7x:2x2x1
jax: 0.10.0
libtpu: 0.0.40
codegen_flags: <defaults>
</compile_context>

<pallas_src>
import math
import functools

import jax
import jax.numpy as jnp
from jax.experimental import pallas as pl
from jax.experimental.pallas import tpu as pltpu


# ----------------------------------------------------------------------------
# Fused kernel: qkv projection + per-head SDPA + output projection (+ bias)
# ----------------------------------------------------------------------------
def _fused_attention_kernel(x_ref, wqkv_ref, wout_ref, bout_ref, o_ref, *,
                            C, N, heads, dim_head, scale, compute_dtype):
    inner = heads * dim_head

    # --- qkv projection: (C*N, D) @ (D, 3*inner) -> (C*N, 3*inner), f32 acc --
    x = x_ref[...].astype(compute_dtype)
    qkv = jnp.dot(x, wqkv_ref[...], preferred_element_type=jnp.float32)
    # 'b c n (3 h d)' view of this batch element: (C, N, 3*inner).
    qkv = qkv.reshape(C, N, 3 * inner)

    wout = wout_ref[...]                                   # (inner, D) bf16
    acc = jnp.zeros((C * N, wout.shape[1]), jnp.float32)   # output accumulator

    # --- per-head attention + partial output projection ----------------------
    # The SDPA q/k/v for head h are (N, C*dim_head); we never build that
    # transposed layout: the C axis rides as the batch dim of the score
    # matmul and is summed, which is mathematically identical.
    for h in range(heads):
        lo = h * dim_head
        q = qkv[:, :, lo:lo + dim_head].astype(compute_dtype)                  # (C, N, dh)
        k = qkv[:, :, inner + lo:inner + lo + dim_head].astype(compute_dtype)  # (C, N, dh)
        v = qkv[:, :, 2 * inner + lo:2 * inner + lo + dim_head].astype(compute_dtype)

        # s[n, m] = sum_{c, j} q[c, n, j] * k[c, m, j]  (transposed contraction,
        # no k.T relayout), then reduce the channel batch dim.
        s_c = jax.lax.dot_general(q, k, (((2,), (2,)), ((0,), (0,))),
                                  preferred_element_type=jnp.float32)          # (C, N, N)
        s = s_c.sum(axis=0) * scale                                            # (N, N)
        # mask = (rand(N, N) <= 1) is all-True in the reference -> elided.
        s = s - jnp.max(s, axis=-1, keepdims=True)
        p = jnp.exp(s)
        p = p * pl.reciprocal(jnp.sum(p, axis=-1, keepdims=True), approx=True)

        # out_h[c, n, j] = sum_m p[n, m] * v[c, m, j] — this is already the
        # 'b c n (h d)' target layout, so no rearrange is ever materialized.
        p_b = jnp.broadcast_to(p.astype(compute_dtype), (C, N, N))
        o_h = jax.lax.dot_general(p_b, v, (((2,), (1,)), ((0,), (0,))),
                                  preferred_element_type=jnp.float32)          # (C, N, dh)

        # Partial output projection: the 'h d' columns [h*dh, (h+1)*dh) hit
        # rows [h*dh, (h+1)*dh) of W_out^T.
        o_h2 = o_h.reshape(C * N, dim_head).astype(compute_dtype)
        acc = acc + jnp.dot(o_h2, wout[lo:lo + dim_head, :],
                            preferred_element_type=jnp.float32)

    o_ref[...] = acc + bout_ref[...]


# ----------------------------------------------------------------------------
# Wrapper
# ----------------------------------------------------------------------------
def attention_forward(x, w_qkv, w_out, b_out, *, heads, dim_head,
                      compute_dtype=jnp.bfloat16):
    """Fused Pallas implementation of Attention.forward.

    x: (B, C, N, dim) float32
    w_qkv: (3*heads*dim_head, dim)   -- PyTorch nn.Linear weight layout
    w_out: (dim, heads*dim_head), b_out: (dim,)
    """
    B, C, N, D = x.shape
    inner = heads * dim_head
    assert w_qkv.shape == (3 * inner, D)
    assert w_out.shape == (D, inner)

    # SDPA scale is 1/sqrt(q.shape[-1]) = 1/sqrt(C*dim_head) in the reference.
    scale = 1.0 / math.sqrt(C * dim_head)

    # Tiny weights: pre-transpose / cast once outside the kernel.
    wqkv_t = w_qkv.T.astype(compute_dtype)          # (D, 3*inner)
    wout_t = w_out.T.astype(compute_dtype)          # (inner, D)
    bias = b_out.reshape(1, D).astype(jnp.float32)

    x_flat = x.reshape(B, C * N, D)                 # free reshape; x stays f32 in HBM

    kernel = functools.partial(
        _fused_attention_kernel, C=C, N=N, heads=heads, dim_head=dim_head,
        scale=scale, compute_dtype=compute_dtype)

    out = pl.pallas_call(
        kernel,
        grid=(B,),
        in_specs=[
            pl.BlockSpec((None, C * N, D), lambda b: (b, 0, 0)),   # x, one batch / step
            pl.BlockSpec((D, 3 * inner), lambda b: (0, 0)),        # W_qkv^T (fetched once)
            pl.BlockSpec((inner, D), lambda b: (0, 0)),            # W_out^T (fetched once)
            pl.BlockSpec((1, D), lambda b: (0, 0)),                # bias     (fetched once)
        ],
        out_specs=pl.BlockSpec((None, C * N, D), lambda b: (b, 0, 0)),
        out_shape=jax.ShapeDtypeStruct((B, C * N, D), jnp.float32),
        compiler_params=pltpu.CompilerParams(
            dimension_semantics=("parallel",)),      # shard batches across TCs (v7x)
    )(x_flat, wqkv_t, wout_t, bias)

    return out.reshape(B, C, N, D)


# ----------------------------------------------------------------------------
# Pure-JAX f32 reference (for numerical check)
# ----------------------------------------------------------------------------
def attention_reference(x, w_qkv, w_out, b_out, *, heads, dim_head):
    B, C, N, D = x.shape
    inner = heads * dim_head
    qkv = jnp.einsum("bcnd,ed->bcne", x, w_qkv)
    qkv = qkv.reshape(B, C, N, 3, heads, dim_head)
    qkv = qkv.transpose(3, 0, 4, 2, 1, 5).reshape(3, B * heads, N, C * dim_head)
    q, k, v = qkv[0], qkv[1], qkv[2]
    scale = 1.0 / math.sqrt(C * dim_head)
    s = jnp.einsum("hnd,hmd->hnm", q, k) * scale
    p = jax.nn.softmax(s, axis=-1)
    out = jnp.einsum("hnm,hmd->hnd", p, v)
    out = (
        out.reshape(B, heads, N, C, dim_head)
        .transpose(0, 3, 2, 1, 4)
        .reshape(B, C, N, inner)
    )
    return jnp.einsum("bcnd,ed->bcne", out, w_out) + b_out


# ----------------------------------------------------------------------------
if __name__ == "__main__":
    # Small shapes consistent with the module's forward.
    B, C, N, dim = 2, 4, 8, 32
    heads, dim_head = 2, 16
    inner = heads * dim_head

    key = jax.random.PRNGKey(0)
    kx, kq, kw, kb = jax.random.split(key, 4)

    x = jax.random.normal(kx, (B, C, N, dim), dtype=jnp.float32)
    # Deterministic parameter init (shapes follow nn.Linear weight layout).
    w_qkv = jax.random.normal(kq, (3 * inner, dim), dtype=jnp.float32) * (1.0 / math.sqrt(dim))
    w_out = jax.random.normal(kw, (dim, inner), dtype=jnp.float32) * (1.0 / math.sqrt(inner))
    b_out = jax.random.normal(kb, (dim,), dtype=jnp.float32) * 0.01

    y = attention_forward(x, w_qkv, w_out, b_out, heads=heads, dim_head=dim_head)
    y = jax.block_until_ready(y)

    y_ref = attention_reference(x, w_qkv, w_out, b_out, heads=heads, dim_head=dim_head)
    assert y.shape == (B, C, N, dim)
    # Tolerance relaxed for bf16 MXU inputs (f32 accumulation) + approx reciprocal.
    assert jnp.allclose(y, y_ref, atol=5e-2, rtol=5e-2), "mismatch vs reference"

    print("KERNEL_OK")
</pallas_src>

<mosaic_0001>
module attributes {stable_mosaic.version = 11 : i64} {
  func.func @_fused_attention_kernel(%arg0: i32, %arg1: memref<1x32x32xf32, #tpu.memory_space<vmem>>, %arg2: memref<32x96xbf16, #tpu.memory_space<vmem>>, %arg3: memref<32x32xbf16, #tpu.memory_space<vmem>>, %arg4: memref<1x32xf32, #tpu.memory_space<vmem>>, %arg5: memref<1x32x32xf32, #tpu.memory_space<vmem>>) attributes {dimension_semantics = [#tpu.dimension_semantics<parallel>], iteration_bounds = array<i64: 2>, scalar_prefetch = 0 : i64, scratch_operands = 0 : i64, tpu.core_type = #tpu.core_type<tc>, window_params = [{transform_indices = @transform_0, window_bounds = array<i64: 1, 32, 32>}, {pipeline_mode = #tpu.pipeline_mode<synchronous>, transform_indices = @transform_1, window_bounds = array<i64: 32, 96>}, {pipeline_mode = #tpu.pipeline_mode<synchronous>, transform_indices = @transform_2, window_bounds = array<i64: 32, 32>}, {pipeline_mode = #tpu.pipeline_mode<synchronous>, transform_indices = @transform_3, window_bounds = array<i64: 1, 32>}, {transform_indices = @transform_4, window_bounds = array<i64: 1, 32, 32>}]} {
    %c0 = arith.constant 0 : index
    %c0_0 = arith.constant 0 : index
    %c0_1 = arith.constant 0 : index
    %0 = vector.load %arg1[%c0, %c0_0, %c0_1] : memref<1x32x32xf32, #tpu.memory_space<vmem>>, vector<1x32x32xf32>
    %1 = vector.shape_cast %0 : vector<1x32x32xf32> to vector<32x32xf32>
    %2 = arith.truncf %1 : vector<32x32xf32> to vector<32x32xbf16>
    %c0_2 = arith.constant 0 : index
    %c0_3 = arith.constant 0 : index
    %3 = vector.load %arg2[%c0_2, %c0_3] : memref<32x96xbf16, #tpu.memory_space<vmem>>, vector<32x96xbf16>
    %cst = arith.constant dense<0.000000e+00> : vector<32x96xf32>
    %4 = tpu.matmul %2, %3, %cst {dimension_numbers = #tpu.dot_dimension_numbers<[1], [0], [0], [1], [0, 0, 1, 1], [], []>} : vector<32x32xbf16>, vector<32x96xbf16>, vector<32x96xf32> -> vector<32x96xf32>
    %5 = vector.shape_cast %4 : vector<32x96xf32> to vector<4x8x96xf32>
    %c0_4 = arith.constant 0 : index
    %c0_5 = arith.constant 0 : index
    %6 = vector.load %arg3[%c0_4, %c0_5] : memref<32x32xbf16, #tpu.memory_space<vmem>>, vector<32x32xbf16>
    %cst_6 = arith.constant 0.000000e+00 : f32
    %7 = vector.broadcast %cst_6 : f32 to vector<32x32xf32>
    %8 = vector.extract_strided_slice %5 {offsets = [0, 0, 0], sizes = [4, 8, 16], strides = [1, 1, 1]} : vector<4x8x96xf32> to vector<4x8x16xf32>
    %9 = arith.truncf %8 : vector<4x8x16xf32> to vector<4x8x16xbf16>
    %10 = vector.extract_strided_slice %5 {offsets = [0, 0, 32], sizes = [4, 8, 16], strides = [1, 1, 1]} : vector<4x8x96xf32> to vector<4x8x16xf32>
    %11 = arith.truncf %10 : vector<4x8x16xf32> to vector<4x8x16xbf16>
    %12 = vector.extract_strided_slice %5 {offsets = [0, 0, 64], sizes = [4, 8, 16], strides = [1, 1, 1]} : vector<4x8x96xf32> to vector<4x8x16xf32>
    %13 = arith.truncf %12 : vector<4x8x16xf32> to vector<4x8x16xbf16>
    %cst_7 = arith.constant dense<0.000000e+00> : vector<4x8x8xf32>
    %14 = tpu.matmul %9, %11, %cst_7 {dimension_numbers = #tpu.dot_dimension_numbers<[2], [2], [1], [1], [0, 0, 0, 1, 1, 1], [0], [0]>} : vector<4x8x16xbf16>, vector<4x8x16xbf16>, vector<4x8x8xf32> -> vector<4x8x8xf32>
    %cst_8 = arith.constant dense<0.000000e+00> : vector<8x8xf32>
    %15 = vector.multi_reduction <add>, %14, %cst_8 [0] : vector<4x8x8xf32> to vector<8x8xf32>
    %cst_9 = arith.constant 1.250000e-01 : f32
    %16 = vector.broadcast %cst_9 : f32 to vector<8x8xf32>
    %17 = arith.mulf %15, %16 : vector<8x8xf32>
    %cst_10 = arith.constant dense<0xFF800000> : vector<8xf32>
    %18 = vector.multi_reduction <maximumf>, %17, %cst_10 [1] : vector<8x8xf32> to vector<8xf32>
    %19 = vector.shape_cast %18 : vector<8xf32> to vector<8x1xf32>
    %20 = vector.broadcast %19 : vector<8x1xf32> to vector<8x8xf32>
    %21 = arith.subf %17, %20 : vector<8x8xf32>
    %22 = math.exp %21 : vector<8x8xf32>
    %cst_11 = arith.constant dense<0.000000e+00> : vector<8xf32>
    %23 = vector.multi_reduction <add>, %22, %cst_11 [1] : vector<8x8xf32> to vector<8xf32>
    %24 = vector.shape_cast %23 : vector<8xf32> to vector<8x1xf32>
    %25 = tpu.reciprocal %24 {approx = true} : vector<8x1xf32> -> vector<8x1xf32>
    %26 = vector.broadcast %25 : vector<8x1xf32> to vector<8x8xf32>
    %27 = arith.mulf %22, %26 : vector<8x8xf32>
    %28 = arith.truncf %27 : vector<8x8xf32> to vector<8x8xbf16>
    %29 = vector.shape_cast %28 : vector<8x8xbf16> to vector<1x8x8xbf16>
    %30 = vector.broadcast %29 : vector<1x8x8xbf16> to vector<4x8x8xbf16>
    %cst_12 = arith.constant dense<0.000000e+00> : vector<4x8x16xf32>
    %31 = tpu.matmul %30, %13, %cst_12 {dimension_numbers = #tpu.dot_dimension_numbers<[2], [1], [1], [2], [0, 0, 0, 1, 1, 2], [0], [0]>} : vector<4x8x8xbf16>, vector<4x8x16xbf16>, vector<4x8x16xf32> -> vector<4x8x16xf32>
    %32 = vector.shape_cast %31 : vector<4x8x16xf32> to vector<32x16xf32>
    %33 = arith.truncf %32 : vector<32x16xf32> to vector<32x16xbf16>
    %34 = vector.extract_strided_slice %6 {offsets = [0, 0], sizes = [16, 32], strides = [1, 1]} : vector<32x32xbf16> to vector<16x32xbf16>
    %cst_13 = arith.constant dense<0.000000e+00> : vector<32x32xf32>
    %35 = tpu.matmul %33, %34, %cst_13 {dimension_numbers = #tpu.dot_dimension_numbers<[1], [0], [0], [1], [0, 0, 1, 1], [], []>} : vector<32x16xbf16>, vector<16x32xbf16>, vector<32x32xf32> -> vector<32x32xf32>
    %36 = arith.addf %7, %35 : vector<32x32xf32>
    %37 = vector.extract_strided_slice %5 {offsets = [0, 0, 16], sizes = [4, 8, 16], strides = [1, 1, 1]} : vector<4x8x96xf32> to vector<4x8x16xf32>
    %38 = arith.truncf %37 : vector<4x8x16xf32> to vector<4x8x16xbf16>
    %39 = vector.extract_strided_slice %5 {offsets = [0, 0, 48], sizes = [4, 8, 16], strides = [1, 1, 1]} : vector<4x8x96xf32> to vector<4x8x16xf32>
    %40 = arith.truncf %39 : vector<4x8x16xf32> to vector<4x8x16xbf16>
    %41 = vector.extract_strided_slice %5 {offsets = [0, 0, 80], sizes = [4, 8, 16], strides = [1, 1, 1]} : vector<4x8x96xf32> to vector<4x8x16xf32>
    %42 = arith.truncf %41 : vector<4x8x16xf32> to vector<4x8x16xbf16>
    %cst_14 = arith.constant dense<0.000000e+00> : vector<4x8x8xf32>
    %43 = tpu.matmul %38, %40, %cst_14 {dimension_numbers = #tpu.dot_dimension_numbers<[2], [2], [1], [1], [0, 0, 0, 1, 1, 1], [0], [0]>} : vector<4x8x16xbf16>, vector<4x8x16xbf16>, vector<4x8x8xf32> -> vector<4x8x8xf32>
    %cst_15 = arith.constant dense<0.000000e+00> : vector<8x8xf32>
    %44 = vector.multi_reduction <add>, %43, %cst_15 [0] : vector<4x8x8xf32> to vector<8x8xf32>
    %cst_16 = arith.constant 1.250000e-01 : f32
    %45 = vector.broadcast %cst_16 : f32 to vector<8x8xf32>
    %46 = arith.mulf %44, %45 : vector<8x8xf32>
    %cst_17 = arith.constant dense<0xFF800000> : vector<8xf32>
    %47 = vector.multi_reduction <maximumf>, %46, %cst_17 [1] : vector<8x8xf32> to vector<8xf32>
    %48 = vector.shape_cast %47 : vector<8xf32> to vector<8x1xf32>
    %49 = vector.broadcast %48 : vector<8x1xf32> to vector<8x8xf32>
    %50 = arith.subf %46, %49 : vector<8x8xf32>
    %51 = math.exp %50 : vector<8x8xf32>
    %cst_18 = arith.constant dense<0.000000e+00> : vector<8xf32>
    %52 = vector.multi_reduction <add>, %51, %cst_18 [1] : vector<8x8xf32> to vector<8xf32>
    %53 = vector.shape_cast %52 : vector<8xf32> to vector<8x1xf32>
    %54 = tpu.reciprocal %53 {approx = true} : vector<8x1xf32> -> vector<8x1xf32>
    %55 = vector.broadcast %54 : vector<8x1xf32> to vector<8x8xf32>
    %56 = arith.mulf %51, %55 : vector<8x8xf32>
    %57 = arith.truncf %56 : vector<8x8xf32> to vector<8x8xbf16>
    %58 = vector.shape_cast %57 : vector<8x8xbf16> to vector<1x8x8xbf16>
    %59 = vector.broadcast %58 : vector<1x8x8xbf16> to vector<4x8x8xbf16>
    %cst_19 = arith.constant dense<0.000000e+00> : vector<4x8x16xf32>
    %60 = tpu.matmul %59, %42, %cst_19 {dimension_numbers = #tpu.dot_dimension_numbers<[2], [1], [1], [2], [0, 0, 0, 1, 1, 2], [0], [0]>} : vector<4x8x8xbf16>, vector<4x8x16xbf16>, vector<4x8x16xf32> -> vector<4x8x16xf32>
    %61 = vector.shape_cast %60 : vector<4x8x16xf32> to vector<32x16xf32>
    %62 = arith.truncf %61 : vector<32x16xf32> to vector<32x16xbf16>
    %63 = vector.extract_strided_slice %6 {offsets = [16, 0], sizes = [16, 32], strides = [1, 1]} : vector<32x32xbf16> to vector<16x32xbf16>
    %cst_20 = arith.constant dense<0.000000e+00> : vector<32x32xf32>
    %64 = tpu.matmul %62, %63, %cst_20 {dimension_numbers = #tpu.dot_dimension_numbers<[1], [0], [0], [1], [0, 0, 1, 1], [], []>} : vector<32x16xbf16>, vector<16x32xbf16>, vector<32x32xf32> -> vector<32x32xf32>
    %65 = arith.addf %36, %64 : vector<32x32xf32>
    %c0_21 = arith.constant 0 : index
    %c0_22 = arith.constant 0 : index
    %66 = vector.load %arg4[%c0_21, %c0_22] : memref<1x32xf32, #tpu.memory_space<vmem>>, vector<1x32xf32>
    %67 = vector.broadcast %66 : vector<1x32xf32> to vector<32x32xf32>
    %68 = arith.addf %65, %67 : vector<32x32xf32>
    %c0_23 = arith.constant 0 : index
    %c0_24 = arith.constant 0 : index
    %c0_25 = arith.constant 0 : index
    %69 = vector.load %arg5[%c0_23, %c0_24, %c0_25] : memref<1x32x32xf32, #tpu.memory_space<vmem>>, vector<1x32x32xf32>
    %70 = vector.shape_cast %69 : vector<1x32x32xf32> to vector<32x32xf32>
    %71 = vector.shape_cast %68 : vector<32x32xf32> to vector<1x32x32xf32>
    tpu.vector_store %arg5[%c0_23, %c0_24, %c0_25], %71 {strides = array<i32>} : memref<1x32x32xf32, #tpu.memory_space<vmem>>, vector<1x32x32xf32>,
    return
  }
  func.func @transform_0(%arg0: i32) -> (i32, i32, i32) {
    %c0_i32 = arith.constant 0 : i32
    %c0_i32_0 = arith.constant 0 : i32
    %c0_i32_1 = arith.constant 0 : i32
    return %arg0, %c0_i32, %c0_i32_0 : i32, i32, i32
  }
  func.func @transform_1(%arg0: i32) -> (i32, i32) {
    %c0_i32 = arith.constant 0 : i32
    %c0_i32_0 = arith.constant 0 : i32
    %c0_i32_1 = arith.constant 0 : i32
    return %c0_i32, %c0_i32_0 : i32, i32
  }
  func.func @transform_2(%arg0: i32) -> (i32, i32) {
    %c0_i32 = arith.constant 0 : i32
    %c0_i32_0 = arith.constant 0 : i32
    %c0_i32_1 = arith.constant 0 : i32
    return %c0_i32, %c0_i32_0 : i32, i32
  }
  func.func @transform_3(%arg0: i32) -> (i32, i32) {
    %c0_i32 = arith.constant 0 : i32
    %c0_i32_0 = arith.constant 0 : i32
    %c0_i32_1 = arith.constant 0 : i32
    return %c0_i32, %c0_i32_0 : i32, i32
  }
  func.func @transform_4(%arg0: i32) -> (i32, i32, i32) {
    %c0_i32 = arith.constant 0 : i32
    %c0_i32_0 = arith.constant 0 : i32
    %c0_i32_1 = arith.constant 0 : i32
    return %arg0, %c0_i32, %c0_i32_0 : i32, i32, i32
  }
}

</mosaic_0001>

<bundles_post_ra>
// kernel: tpu_custom_call.1
= control target key start
LH: loop header
LB: loop body
LE: loop exit
PB: predicated region body
PF: predicated region fallthrough
CT: control target
= control target key end

     0   :  { %9 = vsyncpa [#allocation3], 0  ;;  %s2286_s0 = inlined_call_operand.hbm [shape: f32[2,32,32], index: 0, kind: input, shape index: {}]   ;;  %s2287_s1 = inlined_call_operand.hbm [shape: bf16[32,96], index: 1, kind: input, shape index: {}]   ;;  %s2288_s2 = inlined_call_operand.hbm [shape: bf16[32,32], index: 2, kind: input, shape index: {}]   ;;  %s2289_s3 = inlined_call_operand.vmem [shape: f32[1,32], index: 3, kind: input, shape index: {}]   ;;  %s2290_s4 = inlined_call_operand.hbm [shape: f32[2,32,32], index: 4, kind: output, shape index: {}]  }
   0x1   :  { %11 = vsyncpa [#allocation3 + $0x1], 0 }
   0x2   :  { %12 = vsyncpa [#allocation6], 0 }
   0x3   :  { %13 = vsyncpa [#allocation4], 0 }
   0x4   :  { %15 = vsyncpa [#allocation4 + $0x1], 0  ;;  %s1885_s15 = smov 0   ;;  %s1887_s16 = smov 0  }
   0x5   :  { %s1889_s17 = smov 0   ;;  %s1891_s18 = smov 0  }
   0x6 LB: > { %s1906_s19 = sadd.s32 4294967295, %s1841_s18   ;;  %s1384_s20 = sadd.s32 4294967294, %s1841_s18   ;;  %s1841_s18 = sphi %s1891_s18, %s2310_s18   ;;  %s1837_s17 = sphi %s1889_s17, %s2309_s17   ;;  %s1833_s16 = sphi %s1887_s16, %s2308_s16   ;;  %s1829_s15 = sphi %s1885_s15, %s2307_s15  }
   0x7   : > { %p41_p0 = scmp.ne.s32.totalorder %s1833_s16, %s1829_s15  ;;  %p2291_p1 = scmp.eq.s32.totalorder %s1906_s19, 0 }
   0x8   : > { %p134_p3 = scmp.eq.s32.totalorder %s1384_s20, 1  ;;  %p1385_p5 = scmp.ge.s32.totalorder %s1841_s18, 1 }
   0x9   : > { %p1915_p4 = por %p2291_p1, %p41_p0  ;;  %p141_p7 = scmp.lt.s32.totalorder %s1841_s18, 3 }
   0xa   : > { %p1920_p6 = por %p134_p3, %p41_p0  ;;  %s1843_s24 = smov [#allocation5]  }
   0xb   : > { %s2294_s21 = scalar_select %p1915_p4, 1, 0 }
   0xc   : > { %s2295_s22 = scalar_select %p1920_p6, 1, 0 }
   0xd   : > { %p1925_p8 = pnand %p1385_p5, %p141_p7  ;;  %s153_s25 = sshll.u32 %s1843_s24, 4  ;;  %s1929_s25 = int_to_ptr.vmem [resolvable:$true] %s153_s25 }
   0xe   : > { %s1844_s27 = smov [#allocation7]   ;;  %s1685_s5 = scalar_lea.hbm %s2287_s1, 256 }
   0xf   : > { %p1605_p9 = pneg %p1925_p8  ;;  %s166_s28 = sshll.u32 %s1844_s27, 4  ;;  %s1940_s28 = int_to_ptr.vmem [resolvable:$true] %s166_s28 }
  0x10   : > { %p1686_p12 = scmp.ne.s32.totalorder %s2287_s1, %s1685_s5  ;;  %p1692_p5 = scmp.lt.u32.totalorder %s1685_s5, %s2287_s1 }
  0x11   : > { %p1936_p11 = pnand %p1605_p9, %p2291_p1 }
  0x13   : > { %p1687_p13 = pneg %p1936_p11 }
  0x15   : > { %p1688_p0 = pnand %p1687_p13, %p1686_p12 }
  0x17   : > { %p1689_p3 = pneg %p1688_p0 }
  0x19   : > { %p1694_p7 = pnand %p1692_p5, %p1689_p3 }
  0x1b   : > { %1697 = shalt.err (!%p1694_p7)
}
  0x1c   : > { %s1698_s10 = scalar_lea.vmem %s1929_s25, 256  ;;  %p1706_p2 = scmp.lt.s32.totalorder %s1929_s25, %s1929_s25 }
  0x1d   : > { %p1699_p9 = scmp.ne.s32.totalorder %s1929_s25, %s1698_s10  ;;  %p1707_p12 = scmp.lt.s32.totalorder %s1698_s10, %s1698_s10 }
  0x1f   : > { %p1701_p10 = pnand %p1699_p9, %p1687_p13  ;;  %p1708_p0 = por %p1707_p12, %p1706_p2 }
  0x21   : > { %p1702_p1 = pneg %p1701_p10 }
  0x23   : > { %p1709_p6 = pnand %p1708_p0, %p1702_p1 }
  0x25   : > { %1712 = shalt.err (!%p1709_p6)
}
  0x26   : > { %s1845_s11 = smov 64   ;;  %s1846_s12 = smov 4  }
  0x27   : > { %1608 = dma.hbm_to_vmem [thread:$0]  (!%p1936_p11), %s2287_s1, 256, %s1929_s25, [#allocation6], %s1845_s11, %s1845_s11, %s1846_s12  }
  0x28   : > { %s1713_s27 = scalar_lea.hbm %s2288_s2, 256 }
  0x29   : > { %p1714_p2 = scmp.ne.s32.totalorder %s2288_s2, %s1713_s27  ;;  %p1720_p10 = scmp.lt.u32.totalorder %s1713_s27, %s2288_s2 }
  0x2b   : > { %p1716_p1 = pnand %p1714_p2, %p1687_p13 }
  0x2d   : > { %p1717_p6 = pneg %p1716_p1 }
  0x2f   : > { %p1722_p3 = pnand %p1720_p10, %p1717_p6 }
  0x31   : > { %1725 = shalt.err (!%p1722_p3)
}
  0x32   : > { %s1726_s25 = scalar_lea.vmem %s1940_s28, 256  ;;  %p1734_p12 = scmp.lt.s32.totalorder %s1940_s28, %s1940_s28 }
  0x33   : > { %p1727_p5 = scmp.ne.s32.totalorder %s1940_s28, %s1726_s25  ;;  %p1735_p0 = scmp.lt.s32.totalorder %s1726_s25, %s1726_s25 }
  0x35   : > { %p1729_p7 = pnand %p1727_p5, %p1687_p13  ;;  %p1736_p2 = por %p1735_p0, %p1734_p12 }
  0x37   : > { %p1730_p9 = pneg %p1729_p7 }
  0x39   : > { %p1737_p1 = pnand %p1736_p2, %p1730_p9 }
  0x3b   : > { %1740 = shalt.err (!%p1737_p1)
}
  0x3c   : > { %1611 = dma.hbm_to_vmem [thread:$0]  (!%p1936_p11), %s2288_s2, 256, %s1940_s28, [#allocation6], %s1845_s11, %s1845_s11, %s1846_s12  }
  0x3d   : > { %s1995_s9 = sadd.s32 1, %s1841_s18   ;;  %s28_s26 = sadd.s32 1, %s1837_s17 }
  0x3e   : > { %s25_s10 = ssub.s32 %s1841_s18, %s1995_s9  ;;  %p35_p13 = scmp.ne.s32.totalorder %s1837_s17, %s1833_s16 }
  0x3f   : > { %p26_p6 = scmp.eq.s32.totalorder %s25_s10, 0  ;;  %p36_p10 = scmp.eq.s32.totalorder %s1841_s18, 0 }
  0x40   : > { %p2298_p3 = scmp.eq.s32.totalorder %s1906_s19, 1  ;;  %p1622_p7 = scmp.lt.s32.totalorder %s1841_s18, 2 }
  0x41   : > { %s2011_s14 = scalar_select %p26_p6, %s1837_s17, %s28_s26  }
  0x42   : > { %p2005_p5 = por %p2298_p3, %p35_p13  ;;  %p37_p9 = por %p36_p10, %p35_p13 }
  0x43   : > { %s183_s20 = sand.u32 1, %s1837_s17   ;;  %s1429_s28 = sshll.u32 %s1841_s18, 9 }
  0x44   : > { %s2299_s13 = scalar_select %p2005_p5, 1, 0 }
  0x45   : > { %s1389_s24 = sshll.u32 %s183_s20, 5  ;;  %s2018_s27 = scalar_lea.hbm %s2286_s0, %s1429_s28 }
  0x46   : > { %s187_s29 = scalar_lea.vmem [#allocation2], %s1389_s24  ;;  %p2022_p11 = pnand %p1622_p7, %p37_p9 }
  0x47   : > { %s194_s30 = sshll.u32 %s187_s29, 4  ;;  %s2026_s6 = scalar_lea.sflag [#allocation3], %s183_s20  ;;  %s2020_s30 = int_to_ptr.vmem [resolvable:$true] %s194_s30 }
  0x48   : > { %s1741_s25 = scalar_lea.hbm %s2018_s27, 512  ;;  %p1743_p0 = pneg %p2022_p11 }
  0x49   : > { %p1742_p12 = scmp.ne.s32.totalorder %s2018_s27, %s1741_s25  ;;  %s1746_s26 = scalar_lea.hbm %s2286_s0, 1024 }
  0x4a   : > { %p1747_p13 = scmp.lt.u32.totalorder %s2018_s27, %s2286_s0  ;;  %p1748_p6 = scmp.lt.u32.totalorder %s1746_s26, %s1741_s25 }
  0x4b   : > { %p1744_p2 = pnand %p1743_p0, %p1742_p12  ;;  %p1750_p3 = scmp.lt.u32.totalorder %s1741_s25, %s2018_s27 }
  0x4c   : > { %p1749_p10 = por %p1748_p6, %p1747_p13 }
  0x4d   : > { %p1745_p1 = pneg %p1744_p2 }
  0x4e   : > { %p1751_p7 = por %p1750_p3, %p1749_p10 }
  0x50   : > { %p1752_p9 = pnand %p1751_p7, %p1745_p1 }
  0x52   : > { %1755 = shalt.err (!%p1752_p9)
}
  0x53   : > { %s1756_s20 = scalar_lea.vmem %s2020_s30, 512  ;;  %s1847_s28 = smov [#allocation2]  }
  0x54   : > { %p1757_p12 = scmp.ne.s32.totalorder %s2020_s30, %s1756_s20  ;;  %s1761_s11 = sshll.u32 %s1847_s28, 4  ;;  %s1762_s11 = int_to_ptr.vmem [resolvable:$false] %s1761_s11 }
  0x55   : > { %s1763_s12 = scalar_lea.vmem %s1762_s11, 1024  ;;  %p1764_p4 = scmp.lt.s32.totalorder %s2020_s30, %s1762_s11 }
  0x56   : > { %p1759_p2 = pnand %p1757_p12, %p1743_p0  ;;  %p1765_p13 = scmp.lt.s32.totalorder %s1763_s12, %s1756_s20 }
  0x58   : > { %p1760_p5 = pneg %p1759_p2  ;;  %p1766_p6 = por %p1765_p13, %p1764_p4 }
  0x5a   : > { %p1767_p10 = pnand %p1766_p6, %p1760_p5 }
  0x5c   : > { %1770 = shalt.err (!%p1767_p10)
}
  0x5d   : > { %s1848_s29 = smov 128   ;;  %s1849_s25 = smov 8  }
  0x5e   : > { %1615 = dma.hbm_to_vmem [thread:$0]  (!%p2022_p11), %s2018_s27, 512, %s2020_s30, %s2026_s6, %s1848_s29, %s1848_s29, %s1849_s25  }
  0x5f   : > { %206 = sbr.rel (%p1925_p8) target bundleno = 2024 (0x7e8), region = 36  ;;  %s2057_s7 = sand.u32 (!%p1925_p8), 1, %s1833_s16  }
  0x60   : > { %s1393_s8 = sshll.u32 (!%p1925_p8), %s2057_s7, 5  ;;  %s209_s26 = scalar_lea.sflag (!%p1925_p8), [#allocation3], %s2057_s7 }
  0x61   : > { %s212_s10 = scalar_lea.vmem (!%p1925_p8), [#allocation2], %s1393_s8  ;;  %p2301_p4 = scmp.ne.s32.totalorder (!%p1925_p8), %s2294_s21, 0 }
  0x66   : > { %1816 = dma.done.wait (%p2301_p4), %s209_s26, 512  }
  0x67   : > { %1818 = vsyncadd (%p2301_p4), %s209_s26, 4294966784  ;;  %p2302_p5 = scmp.eq.s32.totalorder %s1906_s19, 0 }
  0x69   : > { %1820 = dma.done.wait (%p2302_p5), [#allocation6], 512   ;;  %p2303_p8 = pmov %p2302_p5 }
  0x6a   : > { %v1673_v0 = vld [vmem:[#allocation5] sm:$0xff]   ;;  %v1674_v1 = vld [vmem:[#allocation5 + $0x8] sm:$0xff]   ;;  %vm268_vm0 = vcmask 261120   ;;  %v248_v4 = vld [vmem:[%s212_s10 + $0x10] sm:$0xff]  ;;  %v1850_v8 = vmov 0.0   ;;  %vm1851_vm1 = vmmov 0  }
  0x6b   : > { %1822 = vsyncadd (%p2303_p8), [#allocation6], 4294966784  ;;  %1473 = vmatprep.subr.bf16.mxu0 %v1673_v0  ;;  %v246_v2 = vld [vmem:[%s212_s10] sm:$0xff]  ;;  %v247_v3 = vld [vmem:[%s212_s10 + $0x8] sm:$0xff]  ;;  %1481 = vmatprep.subr.bf16.mxu1 %v1850_v8  ;;  %s1852_s21 = smov 96   ;;  %s1853_s23 = smov 64  }
  0x6c   : > { %1474 = vmatpush3.bf16.msra.mxu0 %v1673_v0  ;;  %v250_v5 = vpack.c.bf16 %v247_v3, %v246_v2  ;;  %v249_v6 = vld [vmem:[%s212_s10 + $0x18] sm:$0xff]  ;;  %1483 = vmatprep.mubr.msk.bf16.mxu1 %vm1851_vm1, %v1850_v8  ;;  %vm335_vm2 = vcmask 130048   ;;  %vm555_vm3 = vcmask 1043456   ;;  %vm529_vm4 = vcmask 64512   ;;  %s1854_s27 = smov 80   ;;  %s1855_s30 = smov 112  }
  0x6d   : > { %1475 = vmatprep.subr.bf16.mxu0 %v1674_v1  ;;  %v251_v7 = vpack.c.bf16 %v249_v6, %v248_v4  ;;  %s1856_s5 = smov 48   ;;  %s244_s20 = scalar_lea.vmem [#allocation8], %s1393_s8 }
  0x6e   : > { %1477 = vmatprep.mubr.msk.bf16.mxu0 %vm268_vm0, %v250_v5  ;;  %s1292_s28 = sshll.u32 %s244_s20, 4  ;;  %s1430_s11 = sshll.u32 %s1906_s19, 9  ;;  %s2233_s28 = int_to_ptr.vmem [resolvable:$true] %s1292_s28 }
  0x6f   : > { %s2239_s25 = scalar_lea.hbm %s2290_s4, %s1430_s11  ;;  %s1279_s19 = scalar_lea.sflag [#allocation4], %s2057_s7 }
  0x70   : > { %1476 = vmatpush3.bf16.msra.mxu0 %v1674_v1  ;;  %s1771_s8 = scalar_lea.vmem %s2233_s28, 512  ;;  %p2304_p0 = scmp.ne.s32.totalorder %s2299_s13, 0 }
  0x71   : > { %1487 = vmatprep.subr.bf16.mxu0 %v1850_v8  ;;  %p1772_p11 = scmp.ne.s32.totalorder %s2233_s28, %s1771_s8  ;;  %s1857_s26 = smov [#allocation8]  }
  0x72   : > { %s1775_s10 = sshll.u32 %s1857_s26, 4  ;;  %s1776_s10 = int_to_ptr.vmem [resolvable:$false] %s1775_s10 }
  0x73   : > { %1478 = vmatmul.mubr.msk.bf16.vlgmr.msra.gmra.mrb[0].mxu0 %vm268_vm0, %v251_v7  ;;  %p1773_p1 = pnand %p1772_p11, %p2304_p0  ;;  %p1778_p7 = scmp.lt.s32.totalorder %s2233_s28, %s1776_s10 }
  0x74   : > { %1489 = vmatprep.mubr.msk.bf16.mxu0 %vm1851_vm1, %v1850_v8 }
  0x75   : > { %p1774_p3 = pneg %p1773_p1 }
 0x146   : > { %v1479_v9 = vpop.f32.mrb[0].mxu0 }
 0x147   : > { %v2079_v10 = vpack.c.bf16 %v1479_v9, %v1479_v9  ;;  %v309_v11 = vpop.f32.mrb[1].mxu0 }
 0x148   : > { %v2081_v12 = vpack.c.bf16 %v309_v11, %v309_v11  ;;  %v1480_v13 = vpop.f32.mrb[2].mxu0 }
 0x149   : > { %432 = vrot.lane.b32.xlu1 %v2079_v10, %s1852_s21  ;;  %v312_v14 = vpop.f32.mrb[3].mxu0  ;;  %v2085_v15 = vpack.c.bf16 %v1480_v13, %v1480_v13 }
 0x14a   : > { %333 = vrot.lane.b32.xlu0 %v2081_v12, %s1852_s21  ;;  %v2087_v16 = vpack.c.bf16 %v312_v14, %v312_v14 }
 0x14d   : > { %481 = vrot.lane.b32.xlu1 %v2085_v15, %s1852_s21 }
 0x14e   : > { %383 = vrot.lane.b32.xlu0 %v2087_v16, %s1852_s21  ;;  %s1777_s21 = scalar_lea.vmem %s1776_s10, 1024 }
 0x14f   : > { %p1779_p9 = scmp.lt.s32.totalorder %s1777_s21, %s1771_s8 }
 0x151   : > { %599 = vrot.lane.b32.xlu1 %v2087_v16, %s1853_s23  ;;  %p1780_p12 = por %p1779_p9, %p1778_p7 }
 0x153   : > { %p1781_p2 = pnand %p1780_p12, %p1774_p3 }
 0x1bb   : > { %v433_v19 = vpop.permute.xlu1 %432 }
 0x1bc   : > { %v334_v17 = vpop.permute.xlu0 %333  ;;  %v438_v22 = vsel %vm335_vm2, %v433_v19, 0 }
 0x1bd   : > { %v340_v18 = vsel %vm335_vm2, %v334_v17, 0 }
 0x1be   : > { %1482 = vmatpush3.bf16.xpose.msra.mxu1 %v340_v18 }
 0x1bf   : > { %1493 = vmatprep.subr.bf16.mxu1 %v1850_v8  ;;  %v482_v23 = vpop.permute.xlu1 %481 }
 0x1c0   : > { %v384_v20 = vpop.permute.xlu0 %383  ;;  %v487_v24 = vsel %vm335_vm2, %v482_v23, 0 }
 0x1c1   : > { %v389_v21 = vsel %vm335_vm2, %v384_v20, 0 }
 0x1c2   : > { %1488 = vmatpush3.bf16.xpose.msra.mxu0 %v389_v21 }
 0x1c3   : > { %1499 = vmatprep.subr.bf16.mxu0 %v1850_v8  ;;  %v600_v25 = vpop.permute.xlu1 %599 }
 0x1c4   : > { %v602_v26 = vsel %vm555_vm3, %v600_v25, 0 }
 0x1c5   : > { %1484 = vmatmul.mubr.msk.bf16.vlgmr.msra.gmra.mrb[0].mxu1 %vm335_vm2, %v2081_v12 }
 0x1c6   : > { %1494 = vmatpush3.bf16.xpose.msra.mxu1 %v438_v22  ;;  %1495 = vmatprep.mubr.msk.bf16.mxu1 %vm1851_vm1, %v1850_v8 }
 0x1c7   : > { %1505 = vmatprep.subr.bf16.mxu1 %v1850_v8 }
 0x1c9   : > { %1490 = vmatmul.mubr.msk.bf16.vlgmr.msra.gmra.mrb[4].mxu0 %vm335_vm2, %v2087_v16 }
 0x1ca   : > { %1500 = vmatpush3.bf16.xpose.msra.mxu0 %v487_v24  ;;  %1501 = vmatprep.mubr.msk.bf16.mxu0 %vm1851_vm1, %v1850_v8 }
 0x1cb   : > { %1511 = vmatprep.subr.bf16.mxu0 %v1850_v8 }
 0x1cd   : > { %1496 = vmatmul.mubr.msk.bf16.vlgmr.msra.gmra.mrb[4].mxu1 %vm335_vm2, %v2079_v10 }
 0x1ce   : > { %1507 = vmatprep.mubr.msk.bf16.mxu1 %vm1851_vm1, %v1850_v8 }
 0x1d1   : > { %1502 = vmatmul.mubr.msk.bf16.vlgmr.msra.gmra.mrb[8].mxu0 %vm335_vm2, %v2085_v15 }
 0x1d2   : > { %1512 = vmatpush3.bf16.msra.mxu0 %v602_v26  ;;  %1513 = vmatprep.mubr.msk.bf16.mxu0 %vm1851_vm1, %v1850_v8 }
 0x1d3   : > { %1523 = vmatprep.subr.bf16.mxu0 %v1850_v8 }
 0x298   : > { %v376_v27 = vpop.f32.mrb[0].mxu1 }
 0x299   : > { %v1485_v28 = vpop.f32.mrb[1].mxu1  ;;  %v530_v32 = vsel %vm529_vm4, %v376_v27, 0.0 }
 0x29a   : > { %v379_v29 = vpop.f32.mrb[2].mxu1 }
 0x29b   : > { %v1486_v30 = vpop.f32.mrb[3].mxu1 }
 0x29c   : > { %v425_v31 = vpop.f32.mrb[4].mxu0 }
 0x29d   : > { %v531_v33 = vsel %vm529_vm4, %v425_v31, 0.0  ;;  %v1491_v34 = vpop.f32.mrb[5].mxu0 }
 0x29e   : > { %v532_v35 = vadd.f32 %v531_v33, %v530_v32  ;;  %v428_v36 = vpop.f32.mrb[6].mxu0 }
 0x29f   : > { %v1492_v37 = vpop.f32.mrb[7].mxu0 }
 0x2a0   : > { %v474_v38 = vpop.f32.mrb[4].mxu1 }
 0x2a1   : > { %v533_v39 = vsel %vm529_vm4, %v474_v38, 0.0  ;;  %v1497_v40 = vpop.f32.mrb[5].mxu1 }
 0x2a2   : > { %v534_v41 = vadd.f32 %v533_v39, %v532_v35  ;;  %v477_v42 = vpop.f32.mrb[6].mxu1 }
 0x2a3   : > { %v1498_v43 = vpop.f32.mrb[7].mxu1 }
 0x2a4   : > { %v523_v44 = vpop.f32.mrb[8].mxu0 }
 0x2a5   : > { %v535_v45 = vsel %vm529_vm4, %v523_v44, 0.0  ;;  %v1503_v46 = vpop.f32.mrb[9].mxu0 }
 0x2a6   : > { %v536_v47 = vadd.f32 %v535_v45, %v534_v41  ;;  %v526_v48 = vpop.f32.mrb[10].mxu0 }
 0x2a7   : > { %v1504_v49 = vpop.f32.mrb[11].mxu0 }
 0x2a8   : > { %v537_v50 = vmul.f32 0.125, %v536_v47 }
 0x2aa   : > { %v538_v51 = vsel %vm529_vm4, %v537_v50, -inf }
 0x2ab   : > { %539 = vmax.xlane.f32.xlu0 %v538_v51 }
 0x2c1   : > { %550 = vrot.lane.b32.xlu0 %v2081_v12, %s1853_s23 }
 0x2c5   : > { %644 = vrot.lane.b32.xlu0 %v2079_v10, %s1853_s23 }
 0x2c9   : > { %738 = vrot.lane.b32.xlu0 %v2081_v12, %s1854_s27 }
 0x2cd   : > { %736 = vrot.lane.b32.xlu0 %v2081_v12, %s1855_s30 }
 0x2d1   : > { %786 = vrot.lane.b32.xlu0 %v2087_v16, %s1855_s30 }
 0x2d5   : > { %836 = vrot.lane.b32.xlu0 %v2079_v10, %s1855_s30 }
 0x338   : > { %v540_v52 = vpop.xlane.xlu0 %539 }
 0x339   : > { %v541_v53 = vsub.f32 %v537_v50, %v540_v52 }
 0x33b   : > { %v542_v54 = vmul.f32 1.442695, %v541_v53 }
 0x33c   : > { %v551_v55 = vpop.permute.xlu0 %550 }
 0x33d   : > { %1677 = vpow2.f32 %v542_v54  ;;  %v557_v56 = vsel %vm555_vm3, %v551_v55, 0 }
 0x33e   : > { %1506 = vmatpush3.bf16.msra.mxu1 %v557_v56 }
 0x33f   : > { %1517 = vmatprep.subr.bf16.mxu1 %v1850_v8 }
 0x340   : > { %v645_v63 = vpop.permute.xlu0 %644 }
 0x341   : > { %v647_v2 = vsel %vm555_vm3, %v645_v63, 0 }
 0x344   : > { %v739_v4 = vpop.permute.xlu0 %738 }
 0x345   : > { %v744_v6 = vsel %vm335_vm2, %v739_v4, 0 }
 0x347   : > { %v1678_v57 = vpop.eup %1677 }
 0x348   : > { %v544_v58 = vsel %vm529_vm4, %v1678_v57, 0.0  ;;  %v737_v9 = vpop.permute.xlu0 %736 }
 0x349   : > { %545 = vadd.xlane.f32.xlu1 %v544_v58 }
 0x34c   : > { %v787_v13 = vpop.permute.xlu0 %786 }
 0x350   : > { %v837_v19 = vpop.permute.xlu0 %836 }
 0x35a   : > { %689 = vrot.lane.b32.xlu1 %v2085_v15, %s1853_s23 }
 0x35e   : > { %788 = vrot.lane.b32.xlu1 %v2087_v16, %s1854_s27 }
 0x362   : > { %838 = vrot.lane.b32.xlu1 %v2079_v10, %s1854_s27 }
 0x366   : > { %888 = vrot.lane.b32.xlu1 %v2085_v15, %s1854_s27 }
 0x36a   : > { %886 = vrot.lane.b32.xlu1 %v2085_v15, %s1855_s30 }
 0x36e   : > { %1004 = vrot.lane.b32.xlu1 %v2087_v16, %s1856_s5 }
 0x3d6   : > { %v546_v59 = vpop.xlane.xlu1 %545 }
 0x3d7   : > { %1679 = vrcp.f32 %v546_v59 }
 0x3da   : > { %v690_v60 = vpop.permute.xlu1 %689 }
 0x3db   : > { %v692_v3 = vsel %vm555_vm3, %v690_v60, 0 }
 0x3de   : > { %v789_v0 = vpop.permute.xlu1 %788 }
 0x3df   : > { %v794_v7 = vsel %vm335_vm2, %v789_v0, 0 }
 0x3e1   : > { %v1680_v61 = vpop.eup %1679 }
 0x3e2   : > { %v548_v62 = vmul.f32 %v1680_v61, %v1678_v57  ;;  %v839_v5 = vpop.permute.xlu1 %838 }
 0x3e3   : > { %v844_v16 = vsel %vm335_vm2, %v839_v5, 0 }
 0x3e4   : > { %v549_v1 = vpack.c.bf16 %v548_v62, %v548_v62 }
 0x3e6   : > { %1514 = vmatmul.mubr.msk.bf16.vlgmr.msra.gmra.mrb[12].mxu0 %vm529_vm4, %v549_v1  ;;  %1508 = vmatmul.mubr.msk.bf16.vlgmr.msra.gmra.mrb[8].mxu1 %vm529_vm4, %v549_v1  ;;  %v889_v11 = vpop.permute.xlu1 %888 }
 0x3e7   : > { %1524 = vmatpush3.bf16.msra.mxu0 %v692_v3  ;;  %1518 = vmatpush3.bf16.msra.mxu1 %v647_v2  ;;  %v894_v17 = vsel %vm335_vm2, %v889_v11, 0 }
 0x3e8   : > { %1519 = vmatprep.mubr.msk.bf16.mxu1 %vm1851_vm1, %v1850_v8  ;;  %1525 = vmatprep.mubr.msk.bf16.mxu0 %vm1851_vm1, %v1850_v8 }
 0x3e9   : > { %1535 = vmatprep.subr.bf16.mxu0 %v1850_v8  ;;  %1529 = vmatprep.subr.bf16.mxu1 %v1850_v8 }
 0x3ea   : > { %v887_v14 = vpop.permute.xlu1 %886 }
 0x3ee   : > { %1526 = vmatmul.mubr.msk.bf16.vlgmr.msra.gmra.mrb[16].mxu0 %vm529_vm4, %v549_v1  ;;  %1520 = vmatmul.mubr.msk.bf16.vlgmr.msra.gmra.mrb[12].mxu1 %vm529_vm4, %v549_v1  ;;  %v1005_v18 = vpop.permute.xlu1 %1004 }
 0x3ef   : > { %1531 = vmatprep.mubr.msk.bf16.mxu1 %vm1851_vm1, %v1850_v8  ;;  %1537 = vmatprep.mubr.msk.bf16.mxu0 %vm1851_vm1, %v1850_v8  ;;  %v1007_v20 = vsel %vm555_vm3, %v1005_v18, 0 }
 0x3f0   : > { %1530 = vmatpush3.bf16.xpose.msra.mxu1 %v744_v6  ;;  %1536 = vmatpush3.bf16.xpose.msra.mxu0 %v794_v7 }
 0x3f1   : > { %1541 = vmatprep.subr.bf16.mxu1 %v1850_v8  ;;  %1547 = vmatprep.subr.bf16.mxu0 %v1850_v8 }
 0x3f7   : > { %1532 = vmatmul.mubr.msk.bf16.vlgmr.msra.gmra.mrb[16].mxu1 %vm335_vm2, %v737_v9  ;;  %1538 = vmatmul.mubr.msk.bf16.vlgmr.msra.gmra.mrb[20].mxu0 %vm335_vm2, %v787_v13 }
 0x3f8   : > { %1542 = vmatpush3.bf16.xpose.msra.mxu1 %v844_v16  ;;  %1548 = vmatpush3.bf16.xpose.msra.mxu0 %v894_v17  ;;  %v1676_v17 = vld [vmem:[#allocation7] sm:$0xff]  }
 0x3f9   : > { %1543 = vmatprep.mubr.msk.bf16.mxu1 %vm1851_vm1, %v1850_v8  ;;  %1549 = vmatprep.mubr.msk.bf16.mxu0 %vm1851_vm1, %v1850_v8 }
 0x3fa   : > { %1559 = vmatprep.subr.bf16.mxu0 %v1850_v8  ;;  %1553 = vmatprep.subr.bf16.mxu1 %v1850_v8 }
 0x3ff   : > { %1544 = vmatmul.mubr.msk.bf16.vlgmr.msra.gmra.mrb[20].mxu1 %vm335_vm2, %v837_v19  ;;  %1550 = vmatmul.mubr.msk.bf16.vlgmr.msra.gmra.mrb[24].mxu0 %vm335_vm2, %v887_v14 }
 0x400   : > { %1560 = vmatpush3.bf16.msra.mxu0 %v1007_v20  ;;  %1555 = vmatprep.mubr.msk.bf16.mxu1 %vm1851_vm1, %v1850_v8 }
 0x401   : > { %1561 = vmatprep.mubr.msk.bf16.mxu0 %vm1851_vm1, %v1850_v8  ;;  %1571 = vmatprep.subr.bf16.mxu0 %v1850_v8 }
 0x4b9   : > { %v2181_v21 = vpop.f32.mrb[8].mxu1  ;;  %v2183_v22 = vpop.f32.mrb[12].mxu0 }
 0x4ba   : > { %v734_v23 = vpack.c.bf16 %v2183_v22, %v2181_v21  ;;  %v1509_v24 = vpop.f32.mrb[9].mxu1  ;;  %v1515_v25 = vpop.f32.mrb[13].mxu0 }
 0x4bb   : > { %v596_v26 = vpop.f32.mrb[10].mxu1  ;;  %v641_v27 = vpop.f32.mrb[14].mxu0 }
 0x4bc   : > { %v1510_v28 = vpop.f32.mrb[11].mxu1  ;;  %v1516_v29 = vpop.f32.mrb[15].mxu0 }
 0x4c1   : > { %v2187_v30 = vpop.f32.mrb[12].mxu1  ;;  %v2189_v31 = vpop.f32.mrb[16].mxu0 }
 0x4c2   : > { %v735_v32 = vpack.c.bf16 %v2189_v31, %v2187_v30  ;;  %v1521_v33 = vpop.f32.mrb[13].mxu1  ;;  %v1527_v34 = vpop.f32.mrb[17].mxu0 }
 0x4c3   : > { %v686_v35 = vpop.f32.mrb[14].mxu1  ;;  %v731_v36 = vpop.f32.mrb[18].mxu0 }
 0x4c4   : > { %v1522_v37 = vpop.f32.mrb[15].mxu1  ;;  %v1528_v38 = vpop.f32.mrb[19].mxu0 }
 0x4ca   : > { %v780_v39 = vpop.f32.mrb[16].mxu1  ;;  %v830_v40 = vpop.f32.mrb[20].mxu0 }
 0x4cb   : > { %v936_v41 = vsel %vm529_vm4, %v780_v39, 0.0  ;;  %v937_v42 = vsel %vm529_vm4, %v830_v40, 0.0  ;;  %v1533_v43 = vpop.f32.mrb[17].mxu1  ;;  %v1539_v44 = vpop.f32.mrb[21].mxu0 }
 0x4cc   : > { %v938_v45 = vadd.f32 %v937_v42, %v936_v41  ;;  %v783_v46 = vpop.f32.mrb[18].mxu1  ;;  %v833_v47 = vpop.f32.mrb[22].mxu0  ;;  %v1423_v41 = vld [vmem:[%s2289_s3] ss:$0 sm:$0xff] }
 0x4cd   : > { %v1534_v48 = vpop.f32.mrb[19].mxu1  ;;  %v1540_v49 = vpop.f32.mrb[23].mxu0 }
 0x4d2   : > { %v880_v50 = vpop.f32.mrb[20].mxu1  ;;  %v930_v51 = vpop.f32.mrb[24].mxu0 }
 0x4d3   : > { %v939_v52 = vsel %vm529_vm4, %v880_v50, 0.0  ;;  %v1545_v53 = vpop.f32.mrb[21].mxu1  ;;  %v1551_v54 = vpop.f32.mrb[25].mxu0  ;;  %v941_v58 = vsel %vm529_vm4, %v930_v51, 0.0 }
 0x4d4   : > { %v940_v55 = vadd.f32 %v939_v52, %v938_v45  ;;  %v883_v56 = vpop.f32.mrb[22].mxu1  ;;  %v933_v57 = vpop.f32.mrb[26].mxu0 }
 0x4d5   : > { %v1546_v59 = vpop.f32.mrb[23].mxu1  ;;  %v1552_v60 = vpop.f32.mrb[27].mxu0 }
 0x4d6   : > { %v942_v61 = vadd.f32 %v941_v58, %v940_v55 }
 0x4d8   : > { %v943_v62 = vmul.f32 0.125, %v942_v61 }
 0x4da   : > { %v944_v63 = vsel %vm529_vm4, %v943_v62, -inf }
 0x4db   : > { %945 = vmax.xlane.f32.xlu0 %v944_v63 }
 0x4f1   : > { %956 = vrot.lane.b32.xlu0 %v2081_v12, %s1856_s5 }
 0x4f5   : > { %1049 = vrot.lane.b32.xlu0 %v2079_v10, %s1856_s5 }
 0x568   : > { %v946_v0 = vpop.xlane.xlu0 %945 }
 0x569   : > { %v947_v1 = vsub.f32 %v943_v62, %v946_v0 }
 0x56b   : > { %v948_v2 = vmul.f32 1.442695, %v947_v1 }
 0x56c   : > { %v957_v3 = vpop.permute.xlu0 %956 }
 0x56d   : > { %1681 = vpow2.f32 %v948_v2  ;;  %v962_v4 = vsel %vm555_vm3, %v957_v3, 0 }
 0x56e   : > { %1554 = vmatpush3.bf16.msra.mxu1 %v962_v4 }
 0x56f   : > { %1565 = vmatprep.subr.bf16.mxu1 %v1850_v8 }
 0x570   : > { %v1050_v9 = vpop.permute.xlu0 %1049 }
 0x571   : > { %v1052_v14 = vsel %vm555_vm3, %v1050_v9, 0 }
 0x577   : > { %v1682_v5 = vpop.eup %1681 }
 0x578   : > { %v950_v6 = vsel %vm529_vm4, %v1682_v5, 0.0 }
 0x579   : > { %951 = vadd.xlane.f32.xlu1 %v950_v6 }
 0x58a   : > { %1094 = vrot.lane.b32.xlu1 %v2085_v15, %s1856_s5  ;;  %v1675_v15 = vld [vmem:[#allocation7 + $0x8] sm:$0xff]  }
 0x606   : > { %v952_v12 = vpop.xlane.xlu1 %951 }
 0x607   : > { %1683 = vrcp.f32 %v952_v12 }
 0x60a   : > { %v1095_v11 = vpop.permute.xlu1 %1094 }
 0x60b   : > { %v1097_v16 = vsel %vm555_vm3, %v1095_v11, 0 }
 0x611   : > { %v1684_v10 = vpop.eup %1683 }
 0x612   : > { %v954_v7 = vmul.f32 %v1684_v10, %v1682_v5 }
 0x614   : > { %v955_v13 = vpack.c.bf16 %v954_v7, %v954_v7 }
 0x616   : > { %1556 = vmatmul.mubr.msk.bf16.vlgmr.msra.gmra.mrb[24].mxu1 %vm529_vm4, %v955_v13  ;;  %1562 = vmatmul.mubr.msk.bf16.vlgmr.msra.gmra.mrb[28].mxu0 %vm529_vm4, %v955_v13 }
 0x617   : > { %1566 = vmatpush3.bf16.msra.mxu1 %v1052_v14  ;;  %1572 = vmatpush3.bf16.msra.mxu0 %v1097_v16 }
 0x618   : > { %1567 = vmatprep.mubr.msk.bf16.mxu1 %vm1851_vm1, %v1850_v8  ;;  %1573 = vmatprep.mubr.msk.bf16.mxu0 %vm1851_vm1, %v1850_v8 }
 0x619   : > { %1577 = vmatprep.subr.bf16.mxu1 %v1675_v15 }
 0x61e   : > { %1568 = vmatmul.mubr.msk.bf16.vlgmr.msra.gmra.mrb[28].mxu1 %vm529_vm4, %v955_v13  ;;  %1574 = vmatmul.mubr.msk.bf16.vlgmr.msra.gmra.mrb[32].mxu0 %vm529_vm4, %v955_v13 }
 0x61f   : > { %1578 = vmatpush3.bf16.msra.mxu1 %v1675_v15 }
 0x620   : > { %1583 = vmatprep.subr.bf16.mxu1 %v1676_v17 }
 0x6e9   : > { %v998_v18 = vpop.f32.mrb[24].mxu1  ;;  %v1043_v19 = vpop.f32.mrb[28].mxu0 }
 0x6ea   : > { %v1139_v20 = vpack.c.bf16 %v1043_v19, %v998_v18  ;;  %v1557_v24 = vpop.f32.mrb[25].mxu1  ;;  %v1563_v25 = vpop.f32.mrb[29].mxu0 }
 0x6eb   : > { %v1001_v26 = vpop.f32.mrb[26].mxu1  ;;  %v1046_v27 = vpop.f32.mrb[30].mxu0 }
 0x6ec   : > { %v1558_v28 = vpop.f32.mrb[27].mxu1  ;;  %v1564_v29 = vpop.f32.mrb[31].mxu0  ;;  %1579 = vmatprep.mubr.msk.bf16.mxu1 %vm335_vm2, %v1139_v20 }
 0x6f1   : > { %v1088_v8 = vpop.f32.mrb[28].mxu1  ;;  %v1133_v33 = vpop.f32.mrb[32].mxu0 }
 0x6f2   : > { %v1140_v34 = vpack.c.bf16 %v1133_v33, %v1088_v8  ;;  %v1569_v35 = vpop.f32.mrb[29].mxu1  ;;  %v1575_v36 = vpop.f32.mrb[33].mxu0 }
 0x6f3   : > { %v1091_v37 = vpop.f32.mrb[30].mxu1  ;;  %v1136_v38 = vpop.f32.mrb[34].mxu0 }
 0x6f4   : > { %v1570_v39 = vpop.f32.mrb[31].mxu1  ;;  %v1576_v40 = vpop.f32.mrb[35].mxu0  ;;  %1580 = vmatmul.mubr.msk.bf16.vlgmr.msra.gmra.mrb[32].mxu1 %vm335_vm2, %v1140_v34 }
 0x6f5   : > { %1584 = vmatpush3.bf16.msra.mxu1 %v1676_v17  ;;  %1585 = vmatprep.mubr.msk.bf16.mxu1 %vm335_vm2, %v734_v23 }
 0x700   : > { %1586 = vmatmul.mubr.msk.bf16.vlgmr.msra.gmra.mrb[32].mxu1 %vm335_vm2, %v735_v32 }
 0x7d3   : > { %v1587_v42 = vpop.f32.mrb[32].mxu1 }
 0x7d4   : > { %v1272_v43 = vadd.f32 %v1587_v42, %v1423_v41  ;;  %v1248_v21 = vpop.f32.mrb[33].mxu1 }
 0x7d5   : > { %v1270_v22 = vadd.f32 %v1423_v41, %v1248_v21  ;;  %v1588_v23 = vpop.f32.mrb[34].mxu1 }
 0x7d6   : > { %1276 = vst.msk [vmem:[%s244_s20 + $0x10] sm:$0xff] %vm268_vm0, %v1272_v43  ;;  %v1273_v30 = vadd.f32 %v1588_v23, %v1423_v41  ;;  %v1251_v31 = vpop.f32.mrb[35].mxu1 }
 0x7d7   : > { %1274 = vst.msk [vmem:[%s244_s20] sm:$0xff] %vm268_vm0, %v1270_v22  ;;  %v1271_v32 = vadd.f32 %v1423_v41, %v1251_v31 }
 0x7d8   : > { %1277 = vst.msk [vmem:[%s244_s20 + $0x18] sm:$0xff] %vm268_vm0, %v1273_v30 }
 0x7d9   : > { %1275 = vst.msk [vmem:[%s244_s20 + $0x8] sm:$0xff] %vm268_vm0, %v1271_v32 }
 0x7da   : > { %1784 = shalt.err (!%p1781_p2)
}
 0x7db   : > { %s1785_s23 = scalar_lea.hbm %s2239_s25, 512  ;;  %s1789_s5 = scalar_lea.hbm %s2290_s4, 1024 }
 0x7dc   : > { %p1786_p13 = scmp.ne.s32.totalorder %s2239_s25, %s1785_s23  ;;  %p1790_p4 = scmp.lt.u32.totalorder %s2239_s25, %s2290_s4 }
 0x7dd   : > { %p1791_p5 = scmp.lt.u32.totalorder %s1789_s5, %s1785_s23  ;;  %p1793_p11 = scmp.lt.u32.totalorder %s1785_s23, %s2239_s25 }
 0x7de   : > { %p1787_p6 = pnand %p1786_p13, %p2304_p0 }
 0x7df   : > { %p1792_p8 = por %p1791_p5, %p1790_p4 }
 0x7e0   : > { %p1788_p10 = pneg %p1787_p6 }
 0x7e1   : > { %p1794_p1 = por %p1793_p11, %p1792_p8 }
 0x7e3   : > { %p1795_p3 = pnand %p1794_p1, %p1788_p10 }
 0x7e5   : > { %1798 = shalt.err (!%p1795_p3)
}
 0x7e6   : > { %s1858_s20 = smov 128   ;;  %s1859_s11 = smov 8  }
 0x7e7   : > { %1603 = dma.vmem_to_hbm [thread:$0]  (%p2304_p0), %s2233_s28, 512, %s2239_s25, %s1279_s19, %s1858_s20, %s1858_s20, %s1859_s11  }
 0x7e8 PF: > { %s1307_s12 = sand.u32 1, %s1829_s15   ;;  %p2305_p7 = scmp.ne.s32.totalorder %s2295_s22, 0 }
 0x7e9   : > { %p2306_p9 = scmp.ge.s32.totalorder %s1841_s18, 2  ;;  %s1308_s29 = scalar_lea.sflag [#allocation4], %s1307_s12 }
 0x7eb   : > { %p1617_p12 = pnand %p2306_p9, %p2305_p7 }
 0x7ed   : > { %1824 = dma.done.wait (!%p1617_p12), %s1308_s29, 512  }
 0x7ee   : > { %1826 = vsyncadd (!%p1617_p12), %s1308_s29, 4294966784  ;;  %p18_p2 = scmp.ge.s32.totalorder %s1995_s9, 4   ;;  %s2307_s15 = smov %s1833_s16 }
 0x7ef   : > { %s2308_s16 = smov %s1837_s17  ;;  %s2309_s17 = smov %s2011_s14 }
 0x7f0   : > { %s2310_s18 = smov %s1995_s9  ;;  %20 = sbr.rel (!%p18_p2) target bundleno = 6 (0x6), region = 89 }
 0x7f7   :  { %1313 = vsyncpa [#allocation3], 1 }
 0x7f8   :  { %1315 = vsyncpa [#allocation3 + $0x1], 1 }
 0x7f9   :  { %1316 = vsyncpa [#allocation6], 1 }
 0x7fa   :  { %1317 = vsyncpa [#allocation4], 1 }
 0x7fb   :  { %1319 = vsyncpa [#allocation4 + $0x1], 1 }

</bundles_post_ra>
